<compile_context>
chip_gen: v6e
topology: v6e:2x2x1
jax: 0.10.0
libtpu: 0.0.40
codegen_flags: <defaults>
</compile_context>

<pallas_src>
import functools
import math

import jax
import jax.numpy as jnp
from jax.experimental import pallas as pl
from jax.experimental.pallas import tpu as pltpu


def _round_up(x: int, m: int) -> int:
    return (x + m - 1) // m * m


def _linear_kernel_bias(x_ref, w_ref, b_ref, o_ref, acc_ref):
    # x_ref: (tm, tk)  w_ref: (tn, tk)  b_ref: (1, tn)  o_ref: (tm, tn)  acc: f32 (tm, tn)
    k = pl.program_id(2)

    @pl.when(k == 0)
    def _():
        acc_ref[...] = jnp.zeros_like(acc_ref)

    # Contract x's K with weight's K (weight kept in PyTorch (N, K) layout), so
    # no transposed copy of the weight is ever materialized in HBM or VMEM.
    acc_ref[...] += jax.lax.dot_general(
        x_ref[...], w_ref[...],
        dimension_numbers=(((1,), (1,)), ((), ())),
        preferred_element_type=jnp.float32,
    )

    @pl.when(k == pl.num_programs(2) - 1)
    def _():
        o_ref[...] = (acc_ref[...] + b_ref[...]).astype(o_ref.dtype)


def _linear_kernel_nobias(x_ref, w_ref, o_ref, acc_ref):
    k = pl.program_id(2)

    @pl.when(k == 0)
    def _():
        acc_ref[...] = jnp.zeros_like(acc_ref)

    acc_ref[...] += jax.lax.dot_general(
        x_ref[...], w_ref[...],
        dimension_numbers=(((1,), (1,)), ((), ())),
        preferred_element_type=jnp.float32,
    )

    @pl.when(k == pl.num_programs(2) - 1)
    def _():
        o_ref[...] = acc_ref[...].astype(o_ref.dtype)


@functools.partial(jax.jit, static_argnames=("block_m", "block_n", "block_k"))
def xavier_linear(x, weight, bias=None, *, block_m=256, block_n=512, block_k=512):
    """Forward of XavierLinear: y = x @ weight.T + bias.

    x:      (..., in_features)
    weight: (out_features, in_features)   -- PyTorch nn.Linear layout (consumed as-is)
    bias:   (out_features,) or None
    """
    *lead, k_dim = x.shape
    n_dim = weight.shape[0]
    m_dim = math.prod(lead) if lead else 1

    x2d = x.reshape(m_dim, k_dim)

    # Truly tiny problems: per-grid-step pipeline overhead + vreg padding
    # dominate; a single fused XLA dot is as fast or faster.
    if m_dim * k_dim * n_dim < 64 * 64 * 64:
        y2d = jnp.dot(x2d, weight.T, preferred_element_type=jnp.float32)
        if bias is not None:
            y2d = y2d + bias[None, :]
        return y2d.astype(x.dtype).reshape(*lead, n_dim)

    # Tile sizes: clamp targets to the (8,128)-aligned problem size, then pad
    # every dim up to a tile multiple.  Default-tile (256,512,512) f32
    # double-buffered footprint is ~5 MiB, well under the scoped-VMEM default
    # on v5e (16 MiB), v6e (32 MiB) and v7x (32 MiB of 64 MiB physical), so no
    # vmem_limit_bytes override is needed.
    tm = min(block_m, _round_up(m_dim, 8))
    tn = min(block_n, _round_up(n_dim, 128))
    tk = min(block_k, _round_up(k_dim, 128))

    m_p = _round_up(m_dim, tm)
    n_p = _round_up(n_dim, tn)
    k_p = _round_up(k_dim, tk)

    x_pad = jnp.pad(x2d, ((0, m_p - m_dim), (0, k_p - k_dim)))
    w_pad = jnp.pad(weight, ((0, n_p - n_dim), (0, k_p - k_dim)))

    grid = (m_p // tm, n_p // tn, k_p // tk)  # K (reduction) axis last

    itemsize = jnp.dtype(x.dtype).itemsize
    cost = pl.CostEstimate(
        flops=2 * m_p * n_p * k_p,
        transcendentals=0,
        bytes_accessed=(m_p * k_p + n_p * k_p + m_p * n_p) * itemsize,
    )
    compiler_params = pltpu.CompilerParams(
        dimension_semantics=("parallel", "parallel", "arbitrary"))
    out_shape = jax.ShapeDtypeStruct((m_p, n_p), x.dtype)
    scratch = [pltpu.VMEM((tm, tn), jnp.float32)]

    x_spec = pl.BlockSpec((tm, tk), lambda i, j, k: (i, k))
    w_spec = pl.BlockSpec((tn, tk), lambda i, j, k: (j, k))
    o_spec = pl.BlockSpec((tm, tn), lambda i, j, k: (i, j))

    if bias is not None:
        b_pad = jnp.pad(bias, (0, n_p - n_dim)).reshape(1, n_p)
        b_spec = pl.BlockSpec((1, tn), lambda i, j, k: (0, j))  # DMA only the j-th bias tile
        y2d = pl.pallas_call(
            _linear_kernel_bias,
            out_shape=out_shape,
            grid_spec=pltpu.PrefetchScalarGridSpec(
                num_scalar_prefetch=0,
                grid=grid,
                in_specs=[x_spec, w_spec, b_spec],
                out_specs=o_spec,
                scratch_shapes=scratch,
            ),
            compiler_params=compiler_params,
            cost_estimate=cost,
        )(x_pad, w_pad, b_pad)
    else:
        y2d = pl.pallas_call(
            _linear_kernel_nobias,
            out_shape=out_shape,
            grid_spec=pltpu.PrefetchScalarGridSpec(
                num_scalar_prefetch=0,
                grid=grid,
                in_specs=[x_spec, w_spec],
                out_specs=o_spec,
                scratch_shapes=scratch,
            ),
            compiler_params=compiler_params,
            cost_estimate=cost,
        )(x_pad, w_pad)

    return y2d[:m_dim, :n_dim].reshape(*lead, n_dim)


def init_xavier_linear_params(key, in_features, out_features, bias=True,
                              dtype=jnp.float32):
    """Deterministic parameter init matching XavierLinear.__init__:
    - weight: xavier_normal_ -> N(0, sqrt(2/(fan_in+fan_out))), shape (out, in)
    - bias:   nn.Linear default -> U(-1/sqrt(fan_in), 1/sqrt(fan_in))
    """
    kw, kb = jax.random.split(key)
    std = (2.0 / (in_features + out_features)) ** 0.5
    weight = std * jax.random.normal(kw, (out_features, in_features), dtype)
    if not bias:
        return weight, None
    bound = 1.0 / (in_features ** 0.5)
    b = jax.random.uniform(kb, (out_features,), dtype, -bound, bound)
    return weight, b


if __name__ == "__main__":
    key = jax.random.PRNGKey(0)
    k_x, k_p, k_x2, k_p2 = jax.random.split(key, 4)

    # --- Test 1: tiled path with multiple M/N/K grid steps (small blocks to
    #             exercise the accumulator init / epilogue logic). ---
    batch, seq, in_features, out_features = 2, 64, 256, 384
    x = jax.random.normal(k_x, (batch, seq, in_features), jnp.float32)
    weight, bias = init_xavier_linear_params(k_p, in_features, out_features,
                                             bias=True)

    y = xavier_linear(x, weight, bias, block_m=64, block_n=128, block_k=128)
    y = jax.block_until_ready(y)
    y_ref = x @ weight.T + bias
    assert y.shape == (batch, seq, out_features)
    assert jnp.allclose(y, y_ref, atol=1e-3, rtol=1e-3)

    # --- Test 2: non-(8,128)-aligned shapes exercise wrapper padding/slicing. ---
    b2, s2, in2, out2 = 3, 5, 96, 200
    x2 = jax.random.normal(k_x2, (b2, s2, in2), jnp.float32)
    w2, bias2 = init_xavier_linear_params(k_p2, in2, out2, bias=True)
    y2 = jax.block_until_ready(xavier_linear(x2, w2, bias2))
    y2_ref = x2 @ w2.T + bias2
    assert y2.shape == (b2, s2, out2)
    assert jnp.allclose(y2, y2_ref, atol=1e-3, rtol=1e-3)

    # --- Test 3: no-bias branch, default tiles. ---
    y3 = jax.block_until_ready(xavier_linear(x, weight, None))
    y3_ref = x @ weight.T
    assert jnp.allclose(y3, y3_ref, atol=1e-3, rtol=1e-3)

    print("KERNEL_OK")
</pallas_src>

<mosaic_0001>
module attributes {stable_mosaic.version = 11 : i64} {
  func.func @_linear_kernel_bias(%arg0: i32, %arg1: i32, %arg2: i32, %arg3: memref<64x128xf32, #tpu.memory_space<vmem>>, %arg4: memref<128x128xf32, #tpu.memory_space<vmem>>, %arg5: memref<1x128xf32, #tpu.memory_space<vmem>>, %arg6: memref<64x128xf32, #tpu.memory_space<vmem>>, %arg7: memref<64x128xf32, #tpu.memory_space<vmem>>) attributes {dimension_semantics = [#tpu.dimension_semantics<parallel>, #tpu.dimension_semantics<parallel>, #tpu.dimension_semantics<arbitrary>], iteration_bounds = array<i64: 2, 3, 2>, scalar_prefetch = 0 : i64, scratch_operands = 1 : i64, tpu.core_type = #tpu.core_type<tc>, window_params = [{transform_indices = @transform_0, window_bounds = array<i64: 64, 128>}, {transform_indices = @transform_1, window_bounds = array<i64: 128, 128>}, {transform_indices = @transform_2, window_bounds = array<i64: 1, 128>}, {transform_indices = @transform_3, window_bounds = array<i64: 64, 128>}]} {
    %c0_i32 = arith.constant 0 : i32
    %0 = arith.cmpi eq, %arg2, %c0_i32 : i32
    %1 = arith.extui %0 : i1 to i32
    %c0_i32_0 = arith.constant 0 : i32
    %2 = arith.cmpi ne, %1, %c0_i32_0 : i32
    scf.if %2 {
      %cst_9 = arith.constant 0.000000e+00 : f32
      %12 = vector.broadcast %cst_9 : f32 to vector<64x128xf32>
      %c0_10 = arith.constant 0 : index
      %c0_11 = arith.constant 0 : index
      %13 = vector.load %arg7[%c0_10, %c0_11] : memref<64x128xf32, #tpu.memory_space<vmem>>, vector<64x128xf32>
      tpu.vector_store %arg7[%c0_10, %c0_11], %12 {strides = array<i32>} : memref<64x128xf32, #tpu.memory_space<vmem>>, vector<64x128xf32>,
    } else {
    }
    %c0 = arith.constant 0 : index
    %c0_1 = arith.constant 0 : index
    %3 = vector.load %arg7[%c0, %c0_1] : memref<64x128xf32, #tpu.memory_space<vmem>>, vector<64x128xf32>
    %c0_2 = arith.constant 0 : index
    %c0_3 = arith.constant 0 : index
    %4 = vector.load %arg3[%c0_2, %c0_3] : memref<64x128xf32, #tpu.memory_space<vmem>>, vector<64x128xf32>
    %c0_4 = arith.constant 0 : index
    %c0_5 = arith.constant 0 : index
    %5 = vector.load %arg4[%c0_4, %c0_5] : memref<128x128xf32, #tpu.memory_space<vmem>>, vector<128x128xf32>
    %cst = arith.constant dense<0.000000e+00> : vector<64x128xf32>
    %6 = tpu.matmul %4, %5, %cst {dimension_numbers = #tpu.dot_dimension_numbers<[1], [1], [0], [0], [0, 0, 1, 0], [], []>} : vector<64x128xf32>, vector<128x128xf32>, vector<64x128xf32> -> vector<64x128xf32>
    %7 = arith.addf %3, %6 : vector<64x128xf32>
    %c0_6 = arith.constant 0 : index
    %c0_7 = arith.constant 0 : index
    %8 = vector.load %arg7[%c0_6, %c0_7] : memref<64x128xf32, #tpu.memory_space<vmem>>, vector<64x128xf32>
    tpu.vector_store %arg7[%c0_6, %c0_7], %7 {strides = array<i32>} : memref<64x128xf32, #tpu.memory_space<vmem>>, vector<64x128xf32>,
    %c1_i32 = arith.constant 1 : i32
    %9 = arith.cmpi eq, %arg2, %c1_i32 : i32
    %10 = arith.extui %9 : i1 to i32
    %c0_i32_8 = arith.constant 0 : i32
    %11 = arith.cmpi ne, %10, %c0_i32_8 : i32
    scf.if %11 {
      %c0_9 = arith.constant 0 : index
      %c0_10 = arith.constant 0 : index
      %12 = vector.load %arg7[%c0_9, %c0_10] : memref<64x128xf32, #tpu.memory_space<vmem>>, vector<64x128xf32>
      %c0_11 = arith.constant 0 : index
      %c0_12 = arith.constant 0 : index
      %13 = vector.load %arg5[%c0_11, %c0_12] : memref<1x128xf32, #tpu.memory_space<vmem>>, vector<1x128xf32>
      %14 = vector.broadcast %13 : vector<1x128xf32> to vector<64x128xf32>
      %15 = arith.addf %12, %14 : vector<64x128xf32>
      %c0_13 = arith.constant 0 : index
      %c0_14 = arith.constant 0 : index
      %16 = vector.load %arg6[%c0_13, %c0_14] : memref<64x128xf32, #tpu.memory_space<vmem>>, vector<64x128xf32>
      tpu.vector_store %arg6[%c0_13, %c0_14], %15 {strides = array<i32>} : memref<64x128xf32, #tpu.memory_space<vmem>>, vector<64x128xf32>,
    } else {
    }
    return
  }
  func.func @transform_0(%arg0: i32, %arg1: i32, %arg2: i32) -> (i32, i32) {
    %c0_i32 = arith.constant 0 : i32
    return %arg0, %arg2 : i32, i32
  }
  func.func @transform_1(%arg0: i32, %arg1: i32, %arg2: i32) -> (i32, i32) {
    %c0_i32 = arith.constant 0 : i32
    return %arg1, %arg2 : i32, i32
  }
  func.func @transform_2(%arg0: i32, %arg1: i32, %arg2: i32) -> (i32, i32) {
    %c0_i32 = arith.constant 0 : i32
    %c0_i32_0 = arith.constant 0 : i32
    return %c0_i32, %arg1 : i32, i32
  }
  func.func @transform_3(%arg0: i32, %arg1: i32, %arg2: i32) -> (i32, i32) {
    %c0_i32 = arith.constant 0 : i32
    return %arg0, %arg1 : i32, i32
  }
}

</mosaic_0001>

<bundles_post_ra>
// kernel: xavier_linear.1
= control target key start
LH: loop header
LB: loop body
LE: loop exit
PB: predicated region body
PF: predicated region fallthrough
CT: control target
= control target key end

     0   :  { %s1537_s0 = inlined_call_operand.hbm [shape: f32[128,256], index: 0, kind: input, shape index: {}]   ;;  %s1538_s1 = inlined_call_operand.hbm [shape: f32[384,256], index: 1, kind: input, shape index: {}]   ;;  %s1539_s2 = inlined_call_operand.vmem [shape: f32[1,384], index: 2, kind: input, shape index: {}]   ;;  %s1540_s3 = inlined_call_operand.hbm [shape: f32[128,384], index: 3, kind: output, shape index: {}]  }
   0x1   :  { %1553 = sst [smem:[#allocation20_spill]] %s1537_s0 }
   0x2   :  { %1554 = sst [smem:[#allocation21_spill]] %s1538_s1 }
   0x3   :  { %1555 = sst [smem:[#allocation22_spill]] %s1539_s2 }
   0x4   :  { %1556 = sst [smem:[#allocation23_spill]] %s1540_s3 }
   0x5   :  { %8 = vsyncpa [#allocation4], 0 }
   0x6   :  { %10 = vsyncpa [#allocation4 + $0x1], 0 }
   0x7   :  { %11 = vsyncpa [#allocation7], 0 }
   0x8   :  { %13 = vsyncpa [#allocation7 + $0x1], 0 }
   0x9   :  { %14 = vsyncpa [#allocation5], 0 }
   0xa   :  { %16 = vsyncpa [#allocation5 + $0x1], 0  ;;  %s1153_s12 = smov 0   ;;  %s1155_s13 = smov 0  }
   0xb   :  { %s1157_s14 = smov 0   ;;  %s1159_s15 = smov 0  }
   0xc   :  { %s1161_s16 = smov 0   ;;  %s1163_s17 = smov 0  }
   0xd   :  { %s1165_s18 = smov 0   ;;  %s1167_s19 = smov 0  }
   0xe   :  { %s1169_s20 = smov 0   ;;  %s1171_s21 = smov 0  }
   0xf   :  { %s1173_s22 = smov 0   ;;  %s1175_s23 = smov 0  }
  0x10   :  { %s1177_s24 = smov 0   ;;  %s1179_s25 = smov 0  }
  0x11   :  { %s1181_s26 = smov 0   ;;  %s1183_s27 = smov 0  }
  0x12 LB: > { %1557 = sst [smem:[#allocation12_spill]] %s1097_s21  ;;  %s34_s28 = sadd.s32 1, %s1109_s24  ;;  %s1121_s27 = sphi %s1183_s27, %s22_s27   ;;  %s1117_s26 = sphi %s1181_s26, %s1599_s26   ;;  %s1113_s25 = sphi %s1179_s25, %s1612_s25   ;;  %s1109_s24 = sphi %s1177_s24, %s1611_s24   ;;  %s1105_s23 = sphi %s1175_s23, %s1596_s23   ;;  %s1101_s22 = sphi %s1173_s22, %s1610_s22   ;;  %s1097_s21 = sphi %s1171_s21, %s1609_s21   ;;  %s1093_s20 = sphi %s1169_s20, %s1608_s20   ;;  %s1089_s19 = sphi %s1167_s19, %s1607_s19   ;;  %s1085_s18 = sphi %s1165_s18, %s1606_s18   ;;  %s1081_s17 = sphi %s1163_s17, %s1605_s17   ;;  %s1077_s16 = sphi %s1161_s16, %s1604_s16   ;;  %s1073_s15 = sphi %s1159_s15, %s1603_s15   ;;  %s1069_s14 = sphi %s1157_s14, %s1602_s14   ;;  %s1065_s13 = sphi %s1155_s13, %s1601_s13   ;;  %s1061_s12 = sphi %s1153_s12, %s1600_s12  }
  0x13   : > { %1558 = sst [smem:[#allocation13_spill]] %s1101_s22  ;;  %s1541_s29 = sadd.s32 4294967295, %s1121_s27  }
  0x14   : > { %1559 = sst [smem:[#allocation14_spill]] %s1105_s23  ;;  %p1233_p0 = scmp.ge.s32.totalorder %s34_s28, 2 }
  0x15   : > { %1560 = sst [smem:[#allocation15_spill]] %s1117_s26  ;;  %p57_p1 = scmp.ne.s32.totalorder %s1093_s20, %s1089_s19 }
  0x16   : > { %s1614_s28 = smov (%p1233_p0, %s34_s28), 0  ;;  %p1545_p2 = scmp.eq.s32.totalorder %s1121_s27, 0 }
  0x17   : > { %1562 = sst [smem:[#allocation16_spill]] %s1614_s28  ;;  %p63_p3 = scmp.ne.s32.totalorder %s1089_s19, %s1085_s18 }
  0x18   : > { %p1249_p4 = scmp.eq.s32.totalorder %s1541_s29, 0  ;;  %s1255_s7 = ssub.s32 %s1109_s24, %s1614_s28 }
  0x19   : > { %p59_p5 = por %p1545_p2, %p57_p1  ;;  %p764_p7 = scmp.lt.s32.totalorder %s1121_s27, 12 }
  0x1a   : > { %p1261_p6 = por %p1249_p4, %p63_p3  ;;  %s169_s9 = sand.u32 1, %s1093_s20  }
  0x1b   : > { %s623_s10 = sshll.u32 %s169_s9, 6  ;;  %s644_s11 = sshll.u32 %s1117_s26, 4 }
  0x1c   : > { %s179_s18 = sadd.s32 %s1109_s24, %s644_s11  ;;  %s173_s5 = scalar_lea.vmem [#allocation3], %s623_s10 }
  0x1d   : > { %s182_s4 = sshll.u32 %s173_s5, 4  ;;  %s626_s29 = sshll.u32 %s179_s18, 7  ;;  %s183_s4 = int_to_ptr.vmem [resolvable:$true] %s182_s4 }
  0x1e   : > { %s1565_s0 = sld [smem:[#allocation20_spill]]  ;;  %p1274_p8 = pnand %p764_p7, %p59_p5 }
  0x1f   : > { %s170_s2 = scalar_lea.sflag [#allocation4], %s169_s9  ;;  %s914_s22 = scalar_lea.vmem %s183_s4, 1024 }
  0x20   : > { %p903_p9 = pneg %p1274_p8  ;;  %p915_p10 = scmp.ne.s32.totalorder %s183_s4, %s914_s22 }
  0x21   : > { %s1123_s5 = smov [#allocation3]  }
  0x22   : > { %p917_p11 = pnand %p915_p10, %p903_p9  ;;  %s919_s10 = sshll.u32 %s1123_s5, 4  ;;  %s920_s10 = int_to_ptr.vmem [resolvable:$false] %s919_s10 }
  0x23   : > { %s921_s11 = scalar_lea.vmem %s920_s10, 2048  ;;  %p922_p13 = scmp.lt.s32.totalorder %s183_s4, %s920_s10 }
  0x24   : > { %s181_s28 = scalar_lea.hbm %s1565_s0, %s626_s29  ;;  %p918_p12 = pneg %p917_p11 }
  0x25   : > { %p923_p1 = scmp.lt.s32.totalorder %s921_s11, %s914_s22 }
  0x27   : > { %p924_p3 = por %p923_p1, %p922_p13 }
  0x29   : > { %p925_p2 = pnand %p924_p3, %p918_p12 }
  0x2b   : > { %928 = shalt.err (!%p925_p2)
}
  0x2c   : > { %s1546_s3 = smov 256   ;;  %s1547_s22 = smov 128  }
  0x2d   : > { %s1548_s23 = smov 8   ;;  %p631_p2 = scmp.ge.s32.totalorder %s1121_s27, 1 }
  0x2e   : > { %756 = dma.hbm_to_vmem [thread:$0]  (!%p1274_p8), %s181_s28, 1024, %s183_s4, %s170_s2, %s1546_s3, %s1547_s22, %s1548_s23  }
  0x2f   : > { %p219_p5 = scmp.lt.s32.totalorder %s1121_s27, 13  ;;  %s1567_s29 = sadd.s32 4294967295, %s1121_s27  }
  0x30   : > { %p1289_p9 = scmp.eq.s32.totalorder %s1567_s29, 11  ;;  %s620_s21 = sadd.s32 4294967294, %s1121_s27  }
  0x31   : > { %p1293_p10 = pnand %p631_p2, %p219_p5  ;;  %s37_s5 = sadd.s32 1, %s1113_s25 }
  0x32   : > { %s1616_s5 = smov (!%p1233_p0, %s37_s5), %s1113_s25  ;;  %s78_s2 = sadd.s32 1, %s1081_s17 }
  0x33   : > { %p91_p8 = scmp.ne.s32.totalorder %s1077_s16, %s1073_s15  ;;  %p39_p11 = scmp.ge.s32.totalorder %s1616_s5, 3 }
  0x34   : > { %p85_p12 = scmp.ne.s32.totalorder %s1081_s17, %s1077_s16  ;;  %s132_s4 = sadd.s32 1, %s1069_s14 }
  0x35   : > { %p1309_p13 = por %p91_p8, %p1249_p4  ;;  %s1618_s5 = smov (%p39_p11, %s1616_s5), 0 }
  0x36   : > { %1571 = sst [smem:[#allocation17_spill]] %s1618_s5  ;;  %s1572_s10 = sadd.s32 1, %s1117_s26 }
  0x37   : > { %s1620_s10 = smov (!%p39_p11, %s1572_s10), %s1117_s26  ;;  %s73_s30 = ssub.s32 %s1113_s25, %s1618_s5 }
  0x38   : > { %p142_p0 = scmp.ne.s32.totalorder %s1069_s14, %s1065_s13  ;;  %p43_p1 = scmp.ge.s32.totalorder %s1620_s10, 2 }
  0x39   : > { %s75_s15 = sor.u32 %s73_s30, %s1255_s7  ;;  %p148_p2 = scmp.ne.s32.totalorder %s1065_s13, %s1061_s12 }
  0x3a   : > { %p76_p4 = scmp.eq.s32.totalorder %s75_s15, 0  ;;  %p1326_p3 = por %p1289_p9, %p142_p0 }
  0x3b   : > { %s1622_s10 = smov (%p43_p1, %s1620_s10), 0  ;;  %p149_p11 = scmp.eq.s32.totalorder %s620_s21, 11 }
  0x3c   : > { %s1573_s6 = scalar_select %p1326_p3, 1, 0 }
  0x3d   : > { %1574 = sst [smem:[#allocation18_spill]] %s1622_s10  ;;  %s45_s29 = ssub.s32 %s1117_s26, %s1622_s10 }
  0x3e   : > { %s1333_s11 = scalar_select %p76_p4, %s1081_s17, %s78_s2  }
  0x3f   : > { %s47_s3 = sor.u32 %s1255_s7, %s45_s29  ;;  %s129_s22 = sor.u32 %s73_s30, %s45_s29 }
  0x40   : > { %p48_p5 = scmp.eq.s32.totalorder %s47_s3, 0  ;;  %p130_p8 = scmp.eq.s32.totalorder %s129_s22, 0 }
  0x41   : > { %s192_s9 = sand.u32 1, %s1081_s17   ;;  %s1575_s15 = sadd.s32 1, %s1093_s20 }
  0x42   : > { %s1344_s23 = scalar_select %p48_p5, %s1093_s20, %s1575_s15  }
  0x43   : > { %s1347_s0 = scalar_select %p130_p8, %s1069_s14, %s132_s4  }
  0x44   : > { %1576 = sst [smem:[#allocation19_spill]] %s1344_s23  ;;  %p1577_p9 = scmp.eq.s32.totalorder %s1121_s27, 0 }
  0x45   : > { %p1354_p1 = por %p149_p11, %p148_p2  ;;  %s627_s10 = sshll.u32 %s192_s9, 7 }
  0x46   : > { %p87_p0 = por %p85_p12, %p1577_p9  ;;  %s645_s7 = sshll.u32 %s1113_s25, 5 }
  0x47   : > { %s1578_s2 = scalar_select %p1354_p1, 1, 0 }
  0x48   : > { %s202_s30 = sadd.s32 %s1109_s24, %s645_s7  ;;  %s196_s29 = scalar_lea.vmem [#allocation6], %s627_s10 }
  0x49   : > { %s630_s3 = sshll.u32 %s202_s30, 7  ;;  %s205_s22 = sshll.u32 %s196_s29, 4  ;;  %s206_s22 = int_to_ptr.vmem [resolvable:$true] %s205_s22 }
  0x4a   : > { %s1579_s1 = sld [smem:[#allocation21_spill]]  ;;  %p1365_p4 = pnand %p764_p7, %p87_p0 }
  0x4b   : > { %s193_s26 = scalar_lea.sflag [#allocation7], %s192_s9  ;;  %s942_s23 = scalar_lea.vmem %s206_s22, 2048 }
  0x4c   : > { %p931_p12 = pneg %p1365_p4  ;;  %p943_p2 = scmp.ne.s32.totalorder %s206_s22, %s942_s23 }
  0x4d   : > { %s1127_s10 = smov [#allocation6]  }
  0x4e   : > { %p945_p5 = pnand %p943_p2, %p931_p12  ;;  %s947_s7 = sshll.u32 %s1127_s10, 4  ;;  %s948_s7 = int_to_ptr.vmem [resolvable:$false] %s947_s7 }
  0x4f   : > { %s949_s30 = scalar_lea.vmem %s948_s7, 4096  ;;  %p950_p11 = scmp.lt.s32.totalorder %s206_s22, %s948_s7 }
  0x50   : > { %s204_s15 = scalar_lea.hbm %s1579_s1, %s630_s3  ;;  %p946_p8 = pneg %p945_p5 }
  0x51   : > { %p951_p9 = scmp.lt.s32.totalorder %s949_s30, %s942_s23 }
  0x53   : > { %p952_p1 = por %p951_p9, %p950_p11 }
  0x55   : > { %p953_p3 = pnand %p952_p1, %p946_p8 }
  0x57   : > { %956 = shalt.err (!%p953_p3)
}
  0x58   : > { %s1581_s5 = smov 8   ;;  %s1582_s3 = smov 128  }
  0x59   : > { %s1583_s9 = smov 256   ;;  %223 = sbr.rel (%p1293_p10) target bundleno = 424 (0x1a8), region = 32 }
  0x5a   : > { %759 = dma.hbm_to_vmem [thread:$0]  (!%p1365_p4), %s204_s15, 2048, %s206_s22, %s193_s26, %s1583_s9, %s1582_s3, %s1581_s5  }
  0x5b   : > { %s225_s29 = sand.u32 (!%p1293_p10), 1, %s1089_s19  }
  0x5c   : > { %s632_s21 = sshll.u32 (!%p1293_p10), %s225_s29, 6  ;;  %s226_s10 = scalar_lea.sflag (!%p1293_p10), [#allocation4], %s225_s29 }
  0x5d   : > { %s1379_s1 = scalar_lea.vmem (!%p1293_p10), [#allocation3], %s632_s21 }
  0x5e   : > { %1048 = dma.done.wait (%p1261_p6), %s226_s10, 1024  }
  0x5f   : > { %1050 = vsyncadd (%p1261_p6), %s226_s10, 4294966272  ;;  %s234_s23 = sand.u32 1, %s1077_s16  }
  0x60   : > { %s633_s4 = sshll.u32 %s234_s23, 7  ;;  %s235_s26 = scalar_lea.sflag [#allocation7], %s234_s23 }
  0x61   : > { %s1386_s22 = scalar_lea.vmem [#allocation6], %s633_s4 }
  0x62   : > { %1052 = dma.done.wait (%p1309_p13), %s235_s26, 2048  }
  0x63   : > { %1054 = vsyncadd (%p1309_p13), %s235_s26, 4294965248  ;;  %s1584_s18 = sld [smem:[#allocation13_spill]]  ;;  %s266_s15 = sand.u32 1, %s1065_s13  }
  0x64   : > { %s634_s8 = sshll.u32 %s266_s15, 6  ;;  %s1585_s5 = sld [smem:[#allocation22_spill]] }
  0x65   : > { %s1403_s9 = scalar_lea.vmem [#allocation8], %s634_s8  ;;  %s1586_s29 = sld [smem:[#allocation12_spill]] }
  0x69   : > { %p271_p7 = scmp.lt.s32.totalorder %s1584_s18, 2 }
  0x6b   : > { %s1624_s18 = smov (!%p271_p7, %s1584_s18), 2  ;;  %p635_p6 = scmp.ne.s32.totalorder %s1586_s29, 0 }
  0x6c   : > { %s273_s3 = scalar_lea.vmem %s1585_s5, %s1624_s18 }
  0x6d   : > { %278 = sbr.rel (%p635_p6) target bundleno = 119 (0x77), region = 44 }
  0x72   : > { %v1128_v0 = vmov 0.0  }
  0x73   : > { %279 = vst [vmem:[#allocation2 + $0x30] sm:$0xff] %v1128_v0  ;;  %280 = vst [vmem:[#allocation2] sm:$0xff] %v1128_v0 }
  0x74   : > { %281 = vst [vmem:[#allocation2 + $0x18] sm:$0xff] %v1128_v0  ;;  %282 = vst [vmem:[#allocation2 + $0x10] sm:$0xff] %v1128_v0 }
  0x75   : > { %283 = vst [vmem:[#allocation2 + $0x8] sm:$0xff] %v1128_v0  ;;  %284 = vst [vmem:[#allocation2 + $0x20] sm:$0xff] %v1128_v0 }
  0x76   : > { %285 = vst [vmem:[#allocation2 + $0x28] sm:$0xff] %v1128_v0  ;;  %286 = vst [vmem:[#allocation2 + $0x38] sm:$0xff] %v1128_v0 }
  0x77 PF: > { %v318_v1 = vld [vmem:[%s1386_s22 + $0x78] sm:$0xff]  ;;  %v317_v2 = vld [vmem:[%s1386_s22 + $0x70] sm:$0xff]  ;;  %v316_v3 = vld [vmem:[%s1386_s22 + $0x68] sm:$0xff] }
  0x78   : > { %670 = vmatprep.subr.mxu0 %v318_v1  ;;  %714 = vmatprep.subr.mxu1 %v318_v1  ;;  %v295_v4 = vld [vmem:[%s1379_s1] sm:$0xff]  ;;  %v314_v7 = vld [vmem:[%s1386_s22 + $0x58] sm:$0xff]  ;;  %v313_v8 = vld [vmem:[%s1386_s22 + $0x50] sm:$0xff] }
  0x79   : > { %671 = vmatpush3.xpose.msra.mxu0 %v318_v1  ;;  %730 = vmatpush3.xpose.msra.mxu1 %v318_v1  ;;  %v299_v5 = vld [vmem:[%s1379_s1 + $0x20] sm:$0xff]  ;;  %v312_v9 = vld [vmem:[%s1386_s22 + $0x48] sm:$0xff]  ;;  %v310_v11 = vld [vmem:[%s1386_s22 + $0x38] sm:$0xff] }
  0x7a   : > { %672 = vmatprep.subr.mxu0 %v317_v2  ;;  %715 = vmatprep.subr.mxu1 %v317_v2  ;;  %v315_v6 = vld [vmem:[%s1386_s22 + $0x60] sm:$0xff]  ;;  %v309_v12 = vld [vmem:[%s1386_s22 + $0x30] sm:$0xff]  ;;  %v308_v13 = vld [vmem:[%s1386_s22 + $0x28] sm:$0xff] }
  0x7b   : > { %702 = vmatprep.mubr.f32.mxu0 %v295_v4  ;;  %708 = vmatprep.mubr.f32.mxu1 %v299_v5  ;;  %v311_v10 = vld [vmem:[%s1386_s22 + $0x40] sm:$0xff]  ;;  %v306_v15 = vld [vmem:[%s1386_s22 + $0x18] sm:$0xff]  ;;  %v305_v16 = vld [vmem:[%s1386_s22 + $0x10] sm:$0xff] }
  0x7c   : > { %v307_v14 = vld [vmem:[%s1386_s22 + $0x20] sm:$0xff]  ;;  %v304_v17 = vld [vmem:[%s1386_s22 + $0x8] sm:$0xff]  ;;  %v297_v21 = vld [vmem:[%s1379_s1 + $0x10] sm:$0xff] }
  0x7d   : > { %673 = vmatpush3.xpose.msra.mxu0 %v317_v2  ;;  %731 = vmatpush3.xpose.msra.mxu1 %v317_v2  ;;  %v303_v18 = vld [vmem:[%s1386_s22] sm:$0xff]  ;;  %v296_v19 = vld [vmem:[%s1379_s1 + $0x8] sm:$0xff]  ;;  %v301_v22 = vld [vmem:[%s1379_s1 + $0x30] sm:$0xff] }
  0x7e   : > { %674 = vmatprep.subr.mxu0 %v316_v3  ;;  %716 = vmatprep.subr.mxu1 %v316_v3  ;;  %v300_v20 = vld [vmem:[%s1379_s1 + $0x28] sm:$0xff]  ;;  %v298_v23 = vld [vmem:[%s1379_s1 + $0x18] sm:$0xff]  ;;  %v288_v25 = vld [vmem:[#allocation2] sm:$0xff] }
  0x7f   : > { %v302_v24 = vld [vmem:[%s1379_s1 + $0x38] sm:$0xff]  ;;  %v292_v26 = vld [vmem:[#allocation2 + $0x20] sm:$0xff]  ;;  %v287_v29 = vld [vmem:[#allocation2 + $0x30] sm:$0xff]  ;;  %s1587_s1 = sld [smem:[#allocation12_spill]] }
  0x80   : > { %v291_v30 = vld [vmem:[#allocation2 + $0x8] sm:$0xff]  ;;  %v290_v35 = vld [vmem:[#allocation2 + $0x10] sm:$0xff]  ;;  %v294_v36 = vld [vmem:[#allocation2 + $0x38] sm:$0xff] }
  0x81   : > { %675 = vmatpush3.xpose.msra.mxu0 %v316_v3  ;;  %732 = vmatpush3.xpose.msra.mxu1 %v316_v3  ;;  %v289_v41 = vld [vmem:[#allocation2 + $0x18] sm:$0xff]  ;;  %v293_v42 = vld [vmem:[#allocation2 + $0x28] sm:$0xff] }
  0x82   : > { %676 = vmatprep.subr.mxu0 %v315_v6  ;;  %717 = vmatprep.subr.mxu1 %v315_v6 }
  0x85   : > { %677 = vmatpush3.xpose.msra.mxu0 %v315_v6  ;;  %733 = vmatpush3.xpose.msra.mxu1 %v315_v6  ;;  %p636_p10 = scmp.ne.s32.totalorder %s1587_s1, 1 }
  0x86   : > { %678 = vmatprep.subr.mxu0 %v314_v7  ;;  %718 = vmatprep.subr.mxu1 %v314_v7 }
  0x89   : > { %679 = vmatpush3.xpose.msra.mxu0 %v314_v7  ;;  %734 = vmatpush3.xpose.msra.mxu1 %v314_v7 }
  0x8a   : > { %680 = vmatprep.subr.mxu0 %v313_v8  ;;  %719 = vmatprep.subr.mxu1 %v313_v8 }
  0x8d   : > { %681 = vmatpush3.xpose.msra.mxu0 %v313_v8  ;;  %735 = vmatpush3.xpose.msra.mxu1 %v313_v8 }
  0x8e   : > { %682 = vmatprep.subr.mxu0 %v312_v9  ;;  %720 = vmatprep.subr.mxu1 %v312_v9 }
  0x91   : > { %683 = vmatpush3.xpose.msra.mxu0 %v312_v9  ;;  %736 = vmatpush3.xpose.msra.mxu1 %v312_v9 }
  0x92   : > { %684 = vmatprep.subr.mxu0 %v311_v10  ;;  %721 = vmatprep.subr.mxu1 %v311_v10 }
  0x95   : > { %685 = vmatpush3.xpose.msra.mxu0 %v311_v10  ;;  %737 = vmatpush3.xpose.msra.mxu1 %v311_v10 }
  0x96   : > { %686 = vmatprep.subr.mxu0 %v310_v11  ;;  %722 = vmatprep.subr.mxu1 %v310_v11 }
  0x99   : > { %687 = vmatpush3.xpose.msra.mxu0 %v310_v11  ;;  %738 = vmatpush3.xpose.msra.mxu1 %v310_v11 }
  0x9a   : > { %688 = vmatprep.subr.mxu0 %v309_v12  ;;  %723 = vmatprep.subr.mxu1 %v309_v12 }
  0x9d   : > { %689 = vmatpush3.xpose.msra.mxu0 %v309_v12  ;;  %739 = vmatpush3.xpose.msra.mxu1 %v309_v12 }
  0x9e   : > { %690 = vmatprep.subr.mxu0 %v308_v13  ;;  %724 = vmatprep.subr.mxu1 %v308_v13 }
  0xa1   : > { %691 = vmatpush3.xpose.msra.mxu0 %v308_v13  ;;  %740 = vmatpush3.xpose.msra.mxu1 %v308_v13 }
  0xa2   : > { %692 = vmatprep.subr.mxu0 %v307_v14  ;;  %725 = vmatprep.subr.mxu1 %v307_v14 }
  0xa5   : > { %693 = vmatpush3.xpose.msra.mxu0 %v307_v14  ;;  %741 = vmatpush3.xpose.msra.mxu1 %v307_v14 }
  0xa6   : > { %694 = vmatprep.subr.mxu0 %v306_v15  ;;  %726 = vmatprep.subr.mxu1 %v306_v15 }
  0xa9   : > { %695 = vmatpush3.xpose.msra.mxu0 %v306_v15  ;;  %742 = vmatpush3.xpose.msra.mxu1 %v306_v15 }
  0xaa   : > { %696 = vmatprep.subr.mxu0 %v305_v16  ;;  %727 = vmatprep.subr.mxu1 %v305_v16 }
  0xad   : > { %697 = vmatpush3.xpose.msra.mxu0 %v305_v16  ;;  %743 = vmatpush3.xpose.msra.mxu1 %v305_v16 }
  0xae   : > { %698 = vmatprep.subr.mxu0 %v304_v17  ;;  %728 = vmatprep.subr.mxu1 %v304_v17 }
  0xb1   : > { %699 = vmatpush3.xpose.msra.mxu0 %v304_v17  ;;  %744 = vmatpush3.xpose.msra.mxu1 %v304_v17 }
  0xb2   : > { %700 = vmatprep.subr.mxu0 %v303_v18  ;;  %729 = vmatprep.subr.mxu1 %v303_v18 }
  0xb5   : > { %701 = vmatpush3.xpose.msra.mxu0 %v303_v18  ;;  %745 = vmatpush3.xpose.msra.mxu1 %v303_v18 }
  0xb8   : > { %703 = vmatmul.mubr.f32.vlgmr.msra.gmra.mxu0 %v296_v19  ;;  %709 = vmatmul.mubr.f32.vlgmr.msra.gmra.mxu1 %v300_v20 }
  0xb9   : > { %705 = vmatprep.mubr.f32.mxu0 %v297_v21  ;;  %711 = vmatprep.mubr.f32.mxu1 %v301_v22 }
  0xbc   : > { %706 = vmatmul.mubr.f32.gmra.mxu0 %v298_v23  ;;  %712 = vmatmul.mubr.f32.gmra.mxu1 %v302_v24 }
 0x178   : > { %v704_v27 = vpop.f32.mrf.mxu0  ;;  %v710_v28 = vpop.f32.mrf.mxu1 }
 0x179   : > { %v425_v31 = vadd.f32 %v704_v27, %v288_v25  ;;  %v429_v32 = vadd.f32 %v710_v28, %v292_v26 }
 0x17a   : > { %v385_v33 = vpop.f32.mrf.mxu0  ;;  %v405_v34 = vpop.f32.mrf.mxu1 }
 0x17b   : > { %433 = vst [vmem:[#allocation2] sm:$0xff] %v425_v31  ;;  %437 = vst [vmem:[#allocation2 + $0x20] sm:$0xff] %v429_v32  ;;  %v424_v37 = vadd.f32 %v385_v33, %v287_v29  ;;  %v428_v38 = vadd.f32 %v405_v34, %v291_v30 }
 0x17c   : > { %v707_v39 = vpop.f32.mrf.mxu0  ;;  %v713_v40 = vpop.f32.mrf.mxu1 }
 0x17d   : > { %432 = vst [vmem:[#allocation2 + $0x30] sm:$0xff] %v424_v37  ;;  %436 = vst [vmem:[#allocation2 + $0x8] sm:$0xff] %v428_v38  ;;  %v427_v43 = vadd.f32 %v707_v39, %v290_v35  ;;  %v431_v44 = vadd.f32 %v713_v40, %v294_v36  ;;  %443 = sbr.rel (%p636_p10) target bundleno = 396 (0x18c), region = 48 }
 0x17e   : > { %v395_v45 = vpop.f32.mrf.mxu0  ;;  %v415_v46 = vpop.f32.mrf.mxu1 }
 0x17f   : > { %435 = vst [vmem:[#allocation2 + $0x10] sm:$0xff] %v427_v43  ;;  %439 = vst [vmem:[#allocation2 + $0x38] sm:$0xff] %v431_v44  ;;  %v426_v47 = vadd.f32 %v395_v45, %v289_v41  ;;  %v430_v48 = vadd.f32 %v415_v46, %v293_v42 }
 0x181   : > { %434 = vst [vmem:[#allocation2 + $0x18] sm:$0xff] %v426_v47  ;;  %438 = vst [vmem:[#allocation2 + $0x28] sm:$0xff] %v430_v48 }
 0x182   : > { %v637_v50 = vld [vmem:[%s273_s3] ss:$0 sm:$0xff] }
 0x183   : > { %v445_v51 = vld [vmem:[#allocation2] sm:$0xff] }
 0x184   : > { %v444_v49 = vld [vmem:[#allocation2 + $0x30] sm:$0xff]  ;;  %v460_v53 = vadd.f32 %v637_v50, %v445_v51  ;;  %v448_v56 = vld [vmem:[#allocation2 + $0x8] sm:$0xff]  ;;  %v449_v60 = vld [vmem:[#allocation2 + $0x20] sm:$0xff] }
 0x185   : > { %v459_v52 = vadd.f32 %v637_v50, %v444_v49  ;;  %v463_v59 = vadd.f32 %v637_v50, %v448_v56  ;;  %v464_v63 = vadd.f32 %v637_v50, %v449_v60 }
 0x186   : > { %v447_v55 = vld [vmem:[#allocation2 + $0x10] sm:$0xff]  ;;  %v451_v62 = vld [vmem:[#allocation2 + $0x38] sm:$0xff]  ;;  %468 = vst [vmem:[%s1403_s9 + $0x8] sm:$0xff] %v460_v53 }
 0x187   : > { %v462_v58 = vadd.f32 %v637_v50, %v447_v55  ;;  %467 = vst [vmem:[%s1403_s9] sm:$0xff] %v459_v52  ;;  %v466_v1 = vadd.f32 %v637_v50, %v451_v62  ;;  %471 = vst [vmem:[%s1403_s9 + $0x20] sm:$0xff] %v463_v59 }
 0x188   : > { %v446_v54 = vld [vmem:[#allocation2 + $0x18] sm:$0xff]  ;;  %v450_v61 = vld [vmem:[#allocation2 + $0x28] sm:$0xff]  ;;  %472 = vst [vmem:[%s1403_s9 + $0x28] sm:$0xff] %v464_v63 }
 0x189   : > { %v461_v57 = vadd.f32 %v637_v50, %v446_v54  ;;  %v465_v0 = vadd.f32 %v637_v50, %v450_v61  ;;  %470 = vst [vmem:[%s1403_s9 + $0x18] sm:$0xff] %v462_v58  ;;  %474 = vst [vmem:[%s1403_s9 + $0x38] sm:$0xff] %v466_v1 }
 0x18b   : > { %469 = vst [vmem:[%s1403_s9 + $0x10] sm:$0xff] %v461_v57  ;;  %473 = vst [vmem:[%s1403_s9 + $0x30] sm:$0xff] %v465_v0 }
 0x18c PF: > { %s1589_s23 = sld [smem:[#allocation14_spill]]  ;;  %s491_s22 = sshll.u32 %s1403_s9, 4  ;;  %s1447_s22 = int_to_ptr.vmem [resolvable:$true] %s491_s22 }
 0x18d   : > { %s1590_s4 = sld [smem:[#allocation13_spill]]  ;;  %s1456_s29 = scalar_lea.sflag [#allocation5], %s266_s15 }
 0x18e   : > { %s1591_s5 = sld [smem:[#allocation23_spill]]  ;;  %s957_s1 = scalar_lea.vmem %s1447_s22, 1024 }
 0x18f   : > { %p958_p13 = scmp.ne.s32.totalorder %s1447_s22, %s957_s1  ;;  %p1592_p3 = scmp.ne.s32.totalorder %s1573_s6, 0 }
 0x190   : > { %s1129_s9 = smov [#allocation8]  }
 0x191   : > { %p959_p0 = pnand %p958_p13, %p1592_p3  ;;  %s961_s28 = sshll.u32 %s1129_s9, 4  ;;  %s962_s28 = int_to_ptr.vmem [resolvable:$false] %s961_s28 }
 0x192   : > { %s746_s26 = smul.u32 24, %s1589_s23  ;;  %s963_s21 = scalar_lea.vmem %s962_s28, 2048 }
 0x193   : > { %p960_p1 = pneg %p959_p0  ;;  %p964_p4 = scmp.lt.s32.totalorder %s1447_s22, %s962_s28 }
 0x194   : > { %s488_s18 = sadd.s32 %s1590_s4, %s746_s26  ;;  %p965_p12 = scmp.lt.s32.totalorder %s963_s21, %s957_s1 }
 0x195   : > { %s641_s8 = sshll.u32 %s488_s18, 7 }
 0x196   : > { %s1452_s3 = scalar_lea.hbm %s1591_s5, %s641_s8  ;;  %p966_p2 = por %p965_p12, %p964_p4 }
 0x198   : > { %p967_p5 = pnand %p966_p2, %p960_p1 }
 0x19a   : > { %970 = shalt.err (!%p967_p5)
}
 0x19b   : > { %s971_s15 = scalar_lea.hbm %s1452_s3, 1024  ;;  %s975_s4 = scalar_lea.hbm %s1591_s5, 6144 }
 0x19c   : > { %p972_p8 = scmp.ne.s32.totalorder %s1452_s3, %s971_s15  ;;  %p976_p7 = scmp.lt.s32.totalorder %s1452_s3, %s1591_s5 }
 0x19d   : > { %p977_p6 = scmp.lt.s32.totalorder %s975_s4, %s971_s15 }
 0x19e   : > { %p973_p11 = pnand %p972_p8, %p1592_p3 }
 0x19f   : > { %p978_p10 = por %p977_p6, %p976_p7 }
 0x1a0   : > { %p974_p9 = pneg %p973_p11 }
 0x1a2   : > { %p979_p13 = pnand %p978_p10, %p974_p9 }
 0x1a4   : > { %982 = shalt.err (!%p979_p13)
}
 0x1a5   : > { %s1130_s8 = smov 128   ;;  %s1131_s7 = smov 384  }
 0x1a6   : > { %s1132_s30 = smov 8  }
 0x1a7   : > { %751 = dma.vmem_to_hbm [thread:$0]  (%p1592_p3), %s1447_s22, 1024, %s1452_s3, %s1456_s29, %s1130_s8, %s1131_s7, %s1132_s30  }
 0x1a8 PF: > { %p765_p0 = scmp.ge.s32.totalorder %s1121_s27, 2  ;;  %s506_s1 = sand.u32 1, %s1061_s12  }
 0x1a9   : > { %p1593_p1 = scmp.ne.s32.totalorder %s1578_s2, 0  ;;  %s507_s9 = scalar_lea.sflag [#allocation5], %s506_s1 }
 0x1ab   : > { %p761_p4 = pnand %p765_p0, %p1593_p1 }
 0x1ad   : > { %p762_p12 = pneg %p761_p4 }
 0x1af   : > { %1056 = dma.done.wait (%p762_p12), %s507_s9, 1024  }
 0x1b0   : > { %1058 = vsyncadd (%p762_p12), %s507_s9, 4294966272  ;;  %s22_s27 = sadd.s32 1, %s1121_s27   ;;  %s1595_s6 = sld [smem:[#allocation19_spill]] }
 0x1b1   : > { %p1484_p2 = scmp.ge.s32.totalorder %s22_s27, 14   ;;  %s1596_s23 = sld [smem:[#allocation15_spill]] }
 0x1b2   : > { %s1597_s2 = sld [smem:[#allocation16_spill]]  ;;  %s1600_s12 = smov %s1065_s13 }
 0x1b3   : > { %s1598_s3 = sld [smem:[#allocation17_spill]]  ;;  %s1601_s13 = smov %s1069_s14 }
 0x1b4   : > { %s1599_s26 = sld [smem:[#allocation18_spill]]  ;;  %s1602_s14 = smov %s1347_s0 }
 0x1b5   : > { %s1603_s15 = smov %s1077_s16  ;;  %s1604_s16 = smov %s1081_s17 }
 0x1b6   : > { %s1605_s17 = smov %s1333_s11  ;;  %s1606_s18 = smov %s1089_s19 }
 0x1b7   : > { %s1607_s19 = smov %s1093_s20  ;;  %s1608_s20 = smov %s1595_s6 }
 0x1b8   : > { %s1609_s21 = smov %s1109_s24  ;;  %s1610_s22 = smov %s1113_s25 }
 0x1b9   : > { %s1611_s24 = smov %s1597_s2  ;;  %s1612_s25 = smov %s1598_s3 }
 0x1ba   :  { %21 = sbr.rel (!%p1484_p2) target bundleno = 18 (0x12), region = 101 }
 0x1bf   :  { %512 = vsyncpa [#allocation4], 1 }
 0x1c0   :  { %514 = vsyncpa [#allocation4 + $0x1], 1 }
 0x1c1   :  { %515 = vsyncpa [#allocation7], 1 }
 0x1c2   :  { %517 = vsyncpa [#allocation7 + $0x1], 1 }
 0x1c3   :  { %518 = vsyncpa [#allocation5], 1 }
 0x1c4   :  { %520 = vsyncpa [#allocation5 + $0x1], 1 }

</bundles_post_ra>
